<compile_context>
chip_gen: v6e
topology: v6e:2x2x1
jax: 0.10.0
libtpu: 0.0.40
codegen_flags: <defaults>
</compile_context>

<pallas_src>
import functools

import jax
import jax.numpy as jnp
import numpy as np
from jax.experimental import pallas as pl
from jax.experimental.pallas import tpu as pltpu


def _sine_layer_kernel(x_ref, w_ref, b_ref, o_ref, *, omega_0):
    # x_ref: [tm, K], w_ref: [K, tn] (pre-transposed), b_ref: [1, tn]
    acc = jnp.dot(x_ref[...], w_ref[...],
                  preferred_element_type=jnp.float32)        # MXU, f32 acc
    acc = acc + b_ref[...]                                   # broadcast bias
    o_ref[...] = jnp.sin(omega_0 * acc).astype(o_ref.dtype)  # EUP/VPU epilogue


def sine_layer(x, weight, bias, omega_0=30.0, *, tile_m=512, tile_n=512,
               use_bf16=False):
    """x: [..., in_features]; weight: [out_features, in_features] (PyTorch
    nn.Linear layout); bias: [out_features]."""
    in_features = x.shape[-1]
    out_features = weight.shape[0]
    lead_shape = x.shape[:-1]

    compute_dtype = jnp.bfloat16 if use_bf16 else jnp.float32

    x2d = x.reshape(-1, in_features).astype(compute_dtype)
    M = x2d.shape[0]

    # Pre-transpose W once in the wrapper: [K, OUT] (lane-dense last dim).
    w_t = weight.T.astype(compute_dtype)
    b2d = bias.reshape(1, out_features).astype(jnp.float32)

    # Pad OUT to a multiple of 128 -> unmasked lane-dense output stores.
    out_pad = ((out_features + 127) // 128) * 128
    if out_pad != out_features:
        w_t = jnp.pad(w_t, ((0, 0), (0, out_pad - out_features)))
        b2d = jnp.pad(b2d, ((0, 0), (0, out_pad - out_features)))

    # Column tile: largest multiple of 128 <= tile_n that divides out_pad.
    if out_pad <= tile_n:
        tn = out_pad
    else:
        tn = 128
        for cand in range(tile_n, 127, -128):
            if out_pad % cand == 0:
                tn = cand
                break

    # Row tile (sublane-aligned), shrunk to keep a conservative VMEM budget
    # (double-buffered x/W/bias/out tiles) so the config is safe on v7x too.
    tm = min(tile_m, max(8, M))
    tm = ((tm + 7) // 8) * 8
    itemsize = jnp.dtype(compute_dtype).itemsize

    def _vmem_bytes(tm_):
        return 2 * (tm_ * in_features * itemsize      # x tile
                    + in_features * tn * itemsize     # W tile
                    + tn * 4                          # bias tile
                    + tm_ * tn * 4)                   # out tile (f32)

    vmem_budget = 24 * 1024 * 1024
    while tm > 8 and _vmem_bytes(tm) > vmem_budget:
        tm = max(8, ((tm // 2) + 7) // 8 * 8)

    m_pad = ((M + tm - 1) // tm) * tm
    if m_pad != M:
        x2d = jnp.pad(x2d, ((0, m_pad - M), (0, 0)))

    grid = (m_pad // tm, out_pad // tn)

    out = pl.pallas_call(
        functools.partial(_sine_layer_kernel, omega_0=float(omega_0)),
        out_shape=jax.ShapeDtypeStruct((m_pad, out_pad), jnp.float32),
        grid_spec=pltpu.PrefetchScalarGridSpec(
            num_scalar_prefetch=0,
            grid=grid,
            in_specs=[
                pl.BlockSpec((tm, in_features), lambda i, j: (i, 0)),   # x tile
                pl.BlockSpec((in_features, tn), lambda i, j: (0, j)),   # W^T tile
                pl.BlockSpec((1, tn), lambda i, j: (0, j)),             # bias tile
            ],
            out_specs=pl.BlockSpec((tm, tn), lambda i, j: (i, j)),
        ),
        compiler_params=pltpu.CompilerParams(
            dimension_semantics=("parallel", "parallel"),
            vmem_limit_bytes=32 * 1024 * 1024),
    )(x2d, w_t, b2d)

    out = out[:M, :out_features]
    return out.reshape(*lead_shape, out_features)


def init_sine_layer_params(key, in_features, out_features, is_first, omega_0):
    """Deterministic init matching SineLayer.init_weights (uniform ranges)."""
    kw, kb = jax.random.split(key)
    if is_first:
        lim_w = 1.0 / in_features
    else:
        lim_w = np.sqrt(6.0 / in_features) / omega_0
    weight = jax.random.uniform(
        kw, (out_features, in_features), jnp.float32, minval=-lim_w, maxval=lim_w)
    # nn.Linear default bias init: U(-1/sqrt(in_features), 1/sqrt(in_features))
    lim_b = 1.0 / np.sqrt(in_features)
    bias = jax.random.uniform(
        kb, (out_features,), jnp.float32, minval=-lim_b, maxval=lim_b)
    return weight, bias


if __name__ == "__main__":
    key = jax.random.PRNGKey(0)
    k_x, k_p = jax.random.split(key)

    batch, seq, in_features, out_features = 2, 8, 32, 32
    omega_0 = 30.0
    is_first = True

    x = jax.random.uniform(k_x, (batch, seq, in_features), jnp.float32,
                           minval=-1.0, maxval=1.0)
    weight, bias = init_sine_layer_params(k_p, in_features, out_features,
                                          is_first, omega_0)

    out = sine_layer(x, weight, bias, omega_0)
    out = jax.block_until_ready(out)

    # Pure-JAX reference check (f32 path).
    ref = jnp.sin(omega_0 * (x @ weight.T + bias))
    np.testing.assert_allclose(np.asarray(out), np.asarray(ref),
                               rtol=1e-5, atol=1e-5)
    assert out.shape == (batch, seq, out_features)
    print("KERNEL_OK")
</pallas_src>

<mosaic_0001>
module attributes {stable_mosaic.version = 11 : i64} {
  func.func @_sine_layer_kernel(%arg0: i32, %arg1: i32, %arg2: memref<16x32xf32, #tpu.memory_space<vmem>>, %arg3: memref<32x128xf32, #tpu.memory_space<vmem>>, %arg4: memref<1x128xf32, #tpu.memory_space<vmem>>, %arg5: memref<16x128xf32, #tpu.memory_space<vmem>>) attributes {dimension_semantics = [#tpu.dimension_semantics<parallel>, #tpu.dimension_semantics<parallel>], iteration_bounds = array<i64: 1, 1>, scalar_prefetch = 0 : i64, scratch_operands = 0 : i64, tpu.core_type = #tpu.core_type<tc>, window_params = [{transform_indices = @transform_0, window_bounds = array<i64: 16, 32>}, {transform_indices = @transform_1, window_bounds = array<i64: 32, 128>}, {transform_indices = @transform_2, window_bounds = array<i64: 1, 128>}, {transform_indices = @transform_3, window_bounds = array<i64: 16, 128>}]} {
    %c0 = arith.constant 0 : index
    %c0_0 = arith.constant 0 : index
    %0 = vector.load %arg2[%c0, %c0_0] : memref<16x32xf32, #tpu.memory_space<vmem>>, vector<16x32xf32>
    %c0_1 = arith.constant 0 : index
    %c0_2 = arith.constant 0 : index
    %1 = vector.load %arg3[%c0_1, %c0_2] : memref<32x128xf32, #tpu.memory_space<vmem>>, vector<32x128xf32>
    %cst = arith.constant dense<0.000000e+00> : vector<16x128xf32>
    %2 = tpu.matmul %0, %1, %cst {dimension_numbers = #tpu.dot_dimension_numbers<[1], [0], [0], [1], [0, 0, 1, 1], [], []>} : vector<16x32xf32>, vector<32x128xf32>, vector<16x128xf32> -> vector<16x128xf32>
    %c0_3 = arith.constant 0 : index
    %c0_4 = arith.constant 0 : index
    %3 = vector.load %arg4[%c0_3, %c0_4] : memref<1x128xf32, #tpu.memory_space<vmem>>, vector<1x128xf32>
    %4 = vector.broadcast %3 : vector<1x128xf32> to vector<16x128xf32>
    %5 = arith.addf %2, %4 : vector<16x128xf32>
    %cst_5 = arith.constant 3.000000e+01 : f32
    %6 = vector.broadcast %cst_5 : f32 to vector<16x128xf32>
    %7 = arith.mulf %6, %5 : vector<16x128xf32>
    %8 = math.sin %7 : vector<16x128xf32>
    %c0_6 = arith.constant 0 : index
    %c0_7 = arith.constant 0 : index
    %9 = vector.load %arg5[%c0_6, %c0_7] : memref<16x128xf32, #tpu.memory_space<vmem>>, vector<16x128xf32>
    tpu.vector_store %arg5[%c0_6, %c0_7], %8 {strides = array<i32>} : memref<16x128xf32, #tpu.memory_space<vmem>>, vector<16x128xf32>,
    return
  }
  func.func @transform_0(%arg0: i32, %arg1: i32) -> (i32, i32) {
    %c0_i32 = arith.constant 0 : i32
    %c0_i32_0 = arith.constant 0 : i32
    return %arg0, %c0_i32 : i32, i32
  }
  func.func @transform_1(%arg0: i32, %arg1: i32) -> (i32, i32) {
    %c0_i32 = arith.constant 0 : i32
    %c0_i32_0 = arith.constant 0 : i32
    return %c0_i32, %arg1 : i32, i32
  }
  func.func @transform_2(%arg0: i32, %arg1: i32) -> (i32, i32) {
    %c0_i32 = arith.constant 0 : i32
    %c0_i32_0 = arith.constant 0 : i32
    return %c0_i32, %arg1 : i32, i32
  }
  func.func @transform_3(%arg0: i32, %arg1: i32) -> (i32, i32) {
    %c0_i32 = arith.constant 0 : i32
    return %arg0, %arg1 : i32, i32
  }
}

</mosaic_0001>

<bundles_post_ra>
// kernel: tpu_custom_call.1
= control target key start
LH: loop header
LB: loop body
LE: loop exit
PB: predicated region body
PF: predicated region fallthrough
CT: control target
= control target key end

     0   :  { %8 = vsyncpa [#allocation3], 0  ;;  %s612_s0 = inlined_call_operand.hbm [shape: f32[16,32], index: 0, kind: input, shape index: {}]   ;;  %s613_s1 = inlined_call_operand.hbm [shape: f32[32,128], index: 1, kind: input, shape index: {}]   ;;  %s614_s2 = inlined_call_operand.vmem [shape: f32[1,128], index: 2, kind: input, shape index: {}]   ;;  %s615_s3 = inlined_call_operand.hbm [shape: f32[16,128], index: 3, kind: output, shape index: {}]  }
   0x1   :  { %9 = vsyncpa [#allocation6], 0 }
   0x2   :  { %10 = vsyncpa [#allocation4], 0  ;;  %s489_s12 = smov [#allocation2]  }
   0x3   :  { %s16_s13 = sshll.u32 %s489_s12, 4  ;;  %s17_s13 = int_to_ptr.vmem [resolvable:$true] %s16_s13 }
   0x4   :  { %s431_s14 = scalar_lea.vmem %s17_s13, 256  ;;  %p436_p1 = scmp.lt.s32.totalorder %s17_s13, %s17_s13 }
   0x5   :  { %p432_p0 = scmp.ne.s32.totalorder %s17_s13, %s431_s14  ;;  %p437_p2 = scmp.lt.s32.totalorder %s431_s14, %s431_s14 }
   0x7   :  { %p438_p3 = por %p437_p2, %p436_p1 }
   0x9   :  { %p439_p4 = pnand %p438_p3, %p432_p0 }
   0xb   :  { %442 = shalt.err (!%p439_p4)
}
   0xc   :  { %s490_s15 = smov 128   ;;  %s491_s16 = smov 8  }
   0xd   :  { %22 = dma.hbm_to_vmem [thread:$0]  %s612_s0, 256, %s17_s13, [#allocation3], %s490_s15, %s490_s15, %s491_s16  }
   0xe   :  { %s492_s19 = smov [#allocation5]  }
   0xf   :  { %s28_s20 = sshll.u32 %s492_s19, 4  ;;  %s29_s20 = int_to_ptr.vmem [resolvable:$true] %s28_s20 }
  0x10   :  { %s451_s21 = scalar_lea.vmem %s29_s20, 512  ;;  %p456_p6 = scmp.lt.s32.totalorder %s29_s20, %s29_s20 }
  0x11   :  { %p452_p5 = scmp.ne.s32.totalorder %s29_s20, %s451_s21  ;;  %p457_p7 = scmp.lt.s32.totalorder %s451_s21, %s451_s21 }
  0x13   :  { %p458_p8 = por %p457_p7, %p456_p6 }
  0x15   :  { %p459_p9 = pnand %p458_p8, %p452_p5 }
  0x17   :  { %462 = shalt.err (!%p459_p9)
}
  0x18   :  { %34 = dma.hbm_to_vmem [thread:$0]  %s613_s1, 512, %s29_s20, [#allocation6], %s490_s15, %s490_s15, %s491_s16  }
  0x19   :  { %483 = dma.done.wait [#allocation3], 256  }
  0x1a   :  { %484 = vsyncadd [#allocation3], 4294967040 }
  0x1b   :  { %485 = dma.done.wait [#allocation6], 512  }
  0x1c   :  { %486 = vsyncadd [#allocation6], 4294966784  ;;  %vm56_vm0 = vcmask 261120   ;;  %v48_v0 = vld [vmem:[#allocation5 + $0x18] sm:$0xff]  ;;  %v47_v1 = vld [vmem:[#allocation5 + $0x10] sm:$0xff] }
  0x1d   :  { %385 = vmatprep.subr.mxu0 %v48_v0  ;;  %v43_v2 = vld [vmem:[#allocation2] sm:$0xff]  ;;  %v46_v3 = vld [vmem:[#allocation5 + $0x8] sm:$0xff]  ;;  %v45_v4 = vld [vmem:[#allocation5] sm:$0xff]  ;;  %v493_v31 = vmov 683565275  }
  0x1e   :  { %386 = vmatpush3.msra.mxu0 %v48_v0  ;;  %393 = vmatprep.mubr.msk.f32.mxu0 %vm56_vm0, %v43_v2  ;;  %v44_v5 = vld [vmem:[#allocation2 + $0x8] sm:$0xff]  ;;  %v368_v6 = vld [vmem:[%s614_s2] ss:$0 sm:$0xff]  ;;  %v494_v34 = vmov 2475754826   ;;  %s499_s2 = smov [#allocation7]  }
  0x1f   :  { %387 = vmatprep.subr.mxu0 %v47_v1  ;;  %v495_v36 = vmov 2131351028   ;;  %v496_v38 = vmov 2102212464   ;;  %v497_v40 = vmov 920167782  }
  0x20   :  { %388 = vmatpush3.msra.mxu0 %v47_v1  ;;  %v498_v47 = vmov 1326507024   ;;  %s355_s24 = sshll.u32 %s499_s2, 4  ;;  %s356_s24 = int_to_ptr.vmem [resolvable:$true] %s355_s24 }
  0x21   :  { %389 = vmatprep.subr.mxu0 %v46_v3  ;;  %s463_s25 = scalar_lea.vmem %s356_s24, 256  ;;  %p468_p11 = scmp.lt.s32.totalorder %s356_s24, %s356_s24 }
  0x22   :  { %390 = vmatpush3.msra.mxu0 %v46_v3  ;;  %p464_p10 = scmp.ne.s32.totalorder %s356_s24, %s463_s25  ;;  %p469_p12 = scmp.lt.s32.totalorder %s463_s25, %s463_s25 }
  0x23   :  { %391 = vmatprep.subr.mxu0 %v45_v4 }
  0x24   :  { %392 = vmatpush3.msra.mxu0 %v45_v4  ;;  %p470_p13 = por %p469_p12, %p468_p11 }
  0x25   :  { %394 = vmatmul.mubr.msk.f32.vlgmr.msra.gmra.mxu0 %vm56_vm0, %v44_v5 }
  0x26   :  { %p471_p0 = pnand %p470_p13, %p464_p10 }
  0xe5   :  { %v395_v7 = vpop.f32.mrf.mxu0 }
  0xe6   :  { %v135_v8 = vadd.f32 %v395_v7, %v368_v6 }
  0xe7   :  { %v129_v9 = vpop.f32.mrf.mxu0 }
  0xe8   :  { %v537_v10 = vmul.f32 30.0, %v135_v8  ;;  %v130_v11 = vadd.f32 %v368_v6, %v129_v9 }
  0xea   :  { %v244_v12 = vand.u32 2147483647, %v537_v10  ;;  %v247_v13 = vand.u32 2139095040, %v537_v10  ;;  %v541_v14 = vmul.f32 30.0, %v130_v11  ;;  %vm246_vm15 = vcmp.lt.s32.totalorder %v537_v10, 0 }
  0xec   :  { %v248_v15 = vshrl.u32 %v247_v13, 23  ;;  %v251_v16 = vand.u32 8388607, %v244_v12  ;;  %v143_v17 = vand.u32 2139095040, %v541_v14  ;;  %v140_v19 = vand.u32 2147483647, %v541_v14 }
  0xed   :  { %vm591_vm0 = vcmp.le.f32.partialorder %v244_v12, 0.7853982 }
  0xee   :  { %v375_v18 = vadd.s32 4294967169, %v248_v15  ;;  %v144_v20 = vshrl.u32 %v143_v17, 23  ;;  %v252_v22 = vor.u32 8388608, %v251_v16  ;;  %v147_v24 = vand.u32 8388607, %v140_v19 }
  0xf0   :  { %v254_v21 = vadd.s32 1, %v375_v18  ;;  %v371_v23 = vadd.s32 4294967169, %v144_v20  ;;  %v549_v29 = vshll.u32 %v252_v22, 8  ;;  %v148_v33 = vor.u32 8388608, %v147_v24 }
  0xf2   :  { %vm255_vm1 = vcmp.gt.s32.totalorder %v254_v21, 0  ;;  %v150_v26 = vadd.s32 1, %v371_v23  ;;  %v188_v2 = vshll.u32 %v148_v33, 8 }
  0xf3   :  { %v256_v25 = vsel %vm255_vm1, %v254_v21, 0  ;;  %vm142_vm1 = vcmp.lt.s32.totalorder %v541_v14, 0 }
  0xf4   :  { %v257_v27 = vshrl.u32 %v256_v25, 5  ;;  %v258_v28 = vand.u32 31, %v256_v25  ;;  %vm151_vm2 = vcmp.gt.s32.totalorder %v150_v26, 0 }
  0xf5   :  { %v152_v52 = vsel %vm151_vm2, %v150_v26, 0  ;;  %vm141_vm2 = vcmp.le.f32.partialorder %v140_v19, 0.7853982 }
  0xf6   :  { %v259_v30 = vsub.s32 32, %v258_v28  ;;  %v261_v32 = vshll.u32 %v493_v31, %v258_v28  ;;  %v264_v35 = vshll.u32 %v494_v34, %v258_v28  ;;  %v267_v37 = vshll.u32 %v495_v36, %v258_v28 }
  0xf7   :  { %v270_v39 = vshll.u32 %v496_v38, %v258_v28  ;;  %v273_v41 = vshll.u32 %v497_v40, %v258_v28  ;;  %vm276_vm3 = vcmp.lt.s32.totalorder %v257_v27, 1  ;;  %vm278_vm4 = vcmp.lt.s32.totalorder %v257_v27, 3 }
  0xf8   :  { %v262_v42 = vshrl.u32 %v494_v34, %v259_v30  ;;  %v265_v43 = vshrl.u32 %v495_v36, %v259_v30  ;;  %v268_v44 = vshrl.u32 %v496_v38, %v259_v30  ;;  %v260_v45 = vshrl.u32 %v493_v31, %v259_v30 }
  0xf9   :  { %v271_v46 = vshrl.u32 %v497_v40, %v259_v30  ;;  %v274_v48 = vshrl.u32 %v498_v47, %v259_v30  ;;  %vm279_vm5 = vcmp.lt.s32.totalorder %v257_v27, 4  ;;  %v154_v55 = vand.u32 31, %v152_v52 }
  0xfa   :  { %v263_v49 = vor.u32 %v262_v42, %v261_v32  ;;  %v266_v50 = vor.u32 %v265_v43, %v264_v35  ;;  %v269_v51 = vor.u32 %v268_v44, %v267_v37  ;;  %vm277_vm6 = vcmp.lt.s32.totalorder %v257_v27, 2 }
  0xfb   :  { %v272_v53 = vor.u32 %v271_v46, %v270_v39  ;;  %v275_v54 = vor.u32 %v274_v48, %v273_v41  ;;  %v155_v63 = vsub.s32 32, %v154_v55  ;;  %v153_v6 = vshrl.u32 %v152_v52, 5 }
  0xfc   :  { %v280_v56 = vsel %vm276_vm3, %v260_v45, %v263_v49  ;;  %v281_v57 = vsel %vm279_vm5, %v269_v51, 2102212464  ;;  %v284_v58 = vsel %vm276_vm3, %v263_v49, %v266_v50  ;;  %v288_v59 = vsel %vm276_vm3, %v266_v50, %v269_v51 }
  0xfd   :  { %v282_v60 = vsel %vm278_vm4, %v266_v50, %v281_v57  ;;  %v285_v61 = vsel %vm279_vm5, %v272_v53, 920167782  ;;  %v289_v62 = vsel %vm279_vm5, %v275_v54, 1326507024  ;;  %v157_v13 = vshll.u32 %v493_v31, %v154_v55 }
  0xfe   :  { %v286_v0 = vsel %vm278_vm4, %v269_v51, %v285_v61  ;;  %v290_v1 = vsel %vm278_vm4, %v272_v53, %v289_v62  ;;  %v283_v3 = vsel %vm277_vm6, %v280_v56, %v282_v60  ;;  %v158_v15 = vshrl.u32 %v494_v34, %v155_v63 }
  0xff   :  { %v287_v4 = vsel %vm277_vm6, %v284_v58, %v286_v0  ;;  %v291_v5 = vsel %vm277_vm6, %v288_v59, %v290_v1  ;;  %v160_v16 = vshll.u32 %v494_v34, %v154_v55  ;;  %v161_v17 = vshrl.u32 %v495_v36, %v155_v63 }
 0x100   :  { %v561_v7 = vmul.u32.u64.low %v549_v29, %v291_v5  ;;  %v562_v8 = vmul.u32.u64.high %v549_v29, %v291_v5, %v561_v7  ;;  %v565_v9 = vmul.u32.u64.low %v549_v29, %v287_v4  ;;  %v566_v11 = vmul.u32.u64.high %v549_v29, %v287_v4, %v565_v9 }
 0x101   :  { %v163_v18 = vshll.u32 %v495_v36, %v154_v55  ;;  %v164_v20 = vshrl.u32 %v496_v38, %v155_v63  ;;  %v166_v21 = vshll.u32 %v496_v38, %v154_v55  ;;  %v167_v22 = vshrl.u32 %v497_v40, %v155_v63 }
 0x102   :  { %v159_v23 = vor.u32 %v158_v15, %v157_v13  ;;  %v162_v24 = vor.u32 %v161_v17, %v160_v16  ;;  %v169_v25 = vshll.u32 %v497_v40, %v154_v55  ;;  %v170_v26 = vshrl.u32 %v498_v47, %v155_v63 }
 0x103   :  { %v299_v27 = vmul.u32 %v549_v29, %v283_v3  ;;  %vm301_vm7 = vc.u32 %v562_v8, %v565_v9  ;;  %v302_v28 = vadd.s32 1, %v566_v11  ;;  %v165_v30 = vor.u32 %v164_v20, %v163_v18 }
 0x104   :  { %v156_v32 = vshrl.u32 %v493_v31, %v155_v63  ;;  %v168_v33 = vor.u32 %v167_v22, %v166_v21  ;;  %v171_v34 = vor.u32 %v170_v26, %v169_v25  ;;  %vm172_vm8 = vcmp.lt.s32.totalorder %v153_v6, 1 }
 0x105   :  { %v303_v35 = vsel %vm301_vm7, %v302_v28, %v566_v11  ;;  %vm174_vm9 = vcmp.lt.s32.totalorder %v153_v6, 3  ;;  %vm175_vm10 = vcmp.lt.s32.totalorder %v153_v6, 4  ;;  %v180_v36 = vsel %vm172_vm8, %v159_v23, %v162_v24 }
 0x106   :  { %v304_v37 = vadd.s32 %v303_v35, %v299_v27  ;;  %v177_v38 = vsel %vm175_vm10, %v165_v30, 2102212464  ;;  %v181_v39 = vsel %vm175_vm10, %v168_v33, 920167782  ;;  %v184_v29 = vsel %vm172_vm8, %v162_v24, %v165_v30 }
 0x107   :  { %vm173_vm11 = vcmp.lt.s32.totalorder %v153_v6, 2  ;;  %v176_v40 = vsel %vm172_vm8, %v156_v32, %v159_v23  ;;  %v182_v41 = vsel %vm174_vm9, %v165_v30, %v181_v39  ;;  %v185_v42 = vsel %vm175_vm10, %v171_v34, 1326507024 }
 0x108   :  { %v305_v43 = vadd.s32 536870912, %v304_v37  ;;  %v178_v44 = vsel %vm174_vm9, %v162_v24, %v177_v38  ;;  %v183_v45 = vsel %vm173_vm11, %v180_v36, %v182_v41  ;;  %v186_v31 = vsel %vm174_vm9, %v168_v33, %v185_v42 }
 0x109   :  { %v187_v46 = vsel %vm173_vm11, %v184_v29, %v186_v31  ;;  %v576_v47 = vmul.u32.u64.low %v188_v2, %v183_v45  ;;  %v577_v48 = vmul.u32.u64.high %v188_v2, %v183_v45, %v576_v47  ;;  %v179_v52 = vsel %vm173_vm11, %v176_v40, %v178_v44 }
 0x10a   :  { %v306_v49 = vshrl.u32 %v305_v43, 30  ;;  %v579_v50 = vmul.u32.u64.low %v188_v2, %v187_v46  ;;  %v580_v51 = vmul.u32.u64.high %v188_v2, %v187_v46, %v579_v50  ;;  %v195_v56 = vmul.u32 %v188_v2, %v179_v52 }
 0x10b   :  { %v198_v54 = vadd.s32 1, %v577_v48  ;;  %v300_v5 = vadd.s32 %v565_v9, %v562_v8  ;;  %vm336_vm6 = vweird.f32 %v537_v10  ;;  %vm232_vm10 = vweird.f32 %v541_v14 }
 0x10c   :  { %v307_v53 = vshll.u32 %v306_v49, 30  ;;  %vm197_vm12 = vc.u32 %v580_v51, %v576_v47  ;;  %v196_v27 = vadd.s32 %v576_v47, %v580_v51  ;;  %v330_v34 = vsub.s32 4, %v306_v49 }
 0x10d   :  { %v199_v57 = vsel %vm197_vm12, %v198_v54, %v577_v48 }
 0x10e   :  { %v308_v55 = vsub.s32 %v304_v37, %v307_v53  ;;  %v200_v59 = vadd.s32 %v199_v57, %v195_v56  ;;  %v331_v40 = vsel %vm246_vm15, %v330_v34, %v306_v49 }
 0x10f   :  { %v333_v12 = vsel %vm591_vm0, 0, %v331_v40 }
 0x110   :  { %v310_v58 = vsub.s32 0, %v308_v55  ;;  %v201_v61 = vadd.s32 536870912, %v200_v59  ;;  %v337_v31 = vadd.s32 3, %v333_v12 }
 0x112   :  { %v376_v60 = vmin.u32 %v310_v58, %v308_v55  ;;  %v202_v63 = vshrl.u32 %v201_v61, 30  ;;  %v338_v49 = vand.u32 3, %v337_v31 }
 0x114   :  { %v312_v62 = vclz %v376_v60  ;;  %v203_v1 = vshll.u32 %v202_v63, 30  ;;  %v226_v45 = vsub.s32 4, %v202_v63  ;;  %vm343_vm3 = vcmp.eq.s32.totalorder %v338_v49, 2 }
 0x115   :  { %vm340_vm4 = vcmp.eq.s32.totalorder %v338_v49, 0  ;;  %vm339_vm5 = vcmp.lt.s32.totalorder %v338_v49, 2 }
 0x116   :  { %v377_v0 = vadd.s32 4294967294, %v312_v62  ;;  %v204_v3 = vsub.s32 %v200_v59, %v203_v1  ;;  %v227_v48 = vsel %vm142_vm1, %v226_v45, %v202_v63 }
 0x117   :  { %v229_v52 = vsel %vm141_vm2, 0, %v227_v48 }
 0x118   :  { %vm378_vm13 = vcmp.lt.s32.totalorder %v377_v0, 0  ;;  %v206_v7 = vsub.s32 0, %v204_v3  ;;  %v233_v56 = vadd.s32 3, %v229_v52 }
 0x119   :  { %v315_v4 = vsel %vm378_vm13, 0, %v377_v0 }
 0x11a   :  { %v316_v6 = vsub.s32 32, %v315_v4  ;;  %v320_v2 = vsub.s32 4294967266, %v315_v4  ;;  %v317_v11 = vshll.u32 %v308_v55, %v315_v4  ;;  %v372_v16 = vmin.u32 %v206_v7, %v204_v3 }
 0x11b   :  { %v234_v59 = vand.u32 3, %v233_v56 }
 0x11c   :  { %v318_v13 = vshrl.u32 %v300_v5, %v316_v6  ;;  %v321_v15 = vadd.s32 127, %v320_v2  ;;  %v208_v20 = vclz %v372_v16 }
 0x11d   :  { %vm239_vm7 = vcmp.eq.s32.totalorder %v234_v59, 2  ;;  %vm236_vm8 = vcmp.eq.s32.totalorder %v234_v59, 0  ;;  %vm235_vm9 = vcmp.lt.s32.totalorder %v234_v59, 2 }
 0x11e   :  { %v319_v17 = vor.u32 %v318_v13, %v317_v11  ;;  %v322_v18 = vshll.u32 %v321_v15, 23  ;;  %v373_v22 = vadd.s32 4294967294, %v208_v20 }
 0x120   :  { %v323_v21 = vor.u32 4788187, %v322_v18  ;;  %v326_v24 = vcvt.s32.f32 %v319_v17  ;;  %vm374_vm14 = vcmp.lt.s32.totalorder %v373_v22, 0 }
 0x121   :  { %v211_v25 = vsel %vm374_vm14, 0, %v373_v22 }
 0x122   :  { %v324_v23 = vand.u32 2147483647, %v323_v21  ;;  %v212_v8 = vsub.s32 32, %v211_v25  ;;  %v216_v9 = vsub.s32 4294967266, %v211_v25  ;;  %v213_v30 = vshll.u32 %v204_v3, %v211_v25 }
 0x124   :  { %v327_v26 = vmul.f32 %v326_v24, %v324_v23  ;;  %v214_v32 = vshrl.u32 %v196_v27, %v212_v8  ;;  %v217_v33 = vadd.s32 127, %v216_v9 }
 0x126   :  { %v328_v28 = vxor.u32 2147483648, %v327_v26  ;;  %v215_v37 = vor.u32 %v214_v32, %v213_v30  ;;  %v218_v38 = vshll.u32 %v217_v33, 23 }
 0x128   :  { %v329_v36 = vsel %vm246_vm15, %v328_v28, %v327_v26  ;;  %v219_v29 = vor.u32 4788187, %v218_v38  ;;  %v222_v42 = vcvt.s32.f32 %v215_v37 }
 0x129   :  { %v332_v39 = vsel %vm591_vm0, %v537_v10, %v329_v36 }
 0x12a   :  { %415 = vcosq.f32 %v332_v39  ;;  %v220_v41 = vand.u32 2147483647, %v219_v29 }
 0x12b   :  { %417 = vsinq.f32 %v332_v39 }
 0x12c   :  { %v223_v43 = vmul.f32 %v222_v42, %v220_v41 }
 0x12e   :  { %v224_v44 = vxor.u32 2147483648, %v223_v43 }
 0x130   :  { %v225_v46 = vsel %vm142_vm1, %v224_v44, %v223_v43 }
 0x131   :  { %v228_v47 = vsel %vm141_vm2, %v541_v14, %v225_v46 }
 0x132   :  { %419 = vcosq.f32 %v228_v47 }
 0x133   :  { %421 = vsinq.f32 %v228_v47 }
 0x137   :  { %v416_v50 = vpop.eup %415 }
 0x138   :  { %v418_v51 = vpop.eup %417  ;;  %v344_v53 = vxor.u32 2147483648, %v416_v50 }
 0x139   :  { %v341_v54 = vxor.u32 2147483648, %v418_v51 }
 0x13a   :  { %v345_v55 = vsel %vm343_vm3, %v344_v53, %v418_v51 }
 0x13b   :  { %v342_v57 = vsel %vm340_vm4, %v416_v50, %v341_v54 }
 0x13c   :  { %v346_v19 = vsel %vm339_vm5, %v342_v57, %v345_v55 }
 0x13d   :  { %v347_v58 = vsel %vm336_vm6, nan, %v346_v19 }
 0x13e   :  { %349 = vst [vmem:[#allocation7 + $0x8] sm:$0xff] %v347_v58 }
 0x13f   :  { %v420_v60 = vpop.eup %419 }
 0x140   :  { %v422_v61 = vpop.eup %421  ;;  %v240_v62 = vxor.u32 2147483648, %v420_v60 }
 0x141   :  { %v237_v63 = vxor.u32 2147483648, %v422_v61 }
 0x142   :  { %v241_v0 = vsel %vm239_vm7, %v240_v62, %v422_v61 }
 0x143   :  { %v238_v1 = vsel %vm236_vm8, %v420_v60, %v237_v63 }
 0x144   :  { %v242_v3 = vsel %vm235_vm9, %v238_v1, %v241_v0 }
 0x145   :  { %v243_v10 = vsel %vm232_vm10, nan, %v242_v3 }
 0x146   :  { %348 = vst [vmem:[#allocation7] sm:$0xff] %v243_v10 }
 0x147   :  { %474 = shalt.err (!%p471_p0)
}
 0x148   :  { %361 = dma.vmem_to_hbm [thread:$0]  %s356_s24, 256, %s615_s3, [#allocation4], %s490_s15, %s490_s15, %s491_s16  }
 0x149   :  { %487 = dma.done.wait [#allocation4], 256  }
 0x14a   :  { %488 = vsyncadd [#allocation4], 4294967040 }
 0x14b   :  { %365 = vsyncpa [#allocation3], 1 }
 0x14c   :  { %366 = vsyncpa [#allocation6], 1 }
 0x14d   :  { %367 = vsyncpa [#allocation4], 1 }

</bundles_post_ra>
